<compile_context>
chip_gen: v6e
topology: v6e:2x2x1
jax: 0.10.0
libtpu: 0.0.40
codegen_flags: <defaults>
</compile_context>

<pallas_src>
import jax
import jax.numpy as jnp
from jax.experimental import pallas as pl
from jax.experimental.pallas import tpu as pltpu

BN_EPS = 1e-5


def _round_up(x, m):
    return (x + m - 1) // m * m


def _make_mlp_kernel(num_layers, out_widths):
    """Build a fused MLP kernel for `num_layers` Linear layers.

    Layer i computes h = h @ W_i + b_i, followed by tanh for every layer
    except the last.  Biases arrive packed as rows of a single
    (num_layers, Wmax) slab.  All widths are already padded to multiples
    of 128 by the wrapper.
    """

    def kernel(*refs):
        x_ref = refs[0]
        w_refs = refs[1:1 + num_layers]
        b_ref = refs[1 + num_layers]
        out_ref = refs[2 + num_layers]

        h = x_ref[...].astype(jnp.float32)          # (TB, D0p)
        biases = b_ref[...]                         # (num_layers, Wmax) f32

        for i in range(num_layers):
            w = w_refs[i][...]                      # (D_i_pad, D_{i+1}_pad)
            # Cast activations to the weight dtype (bf16 path) only for the
            # MXU push; accumulation and all elementwise math stay in f32.
            h_mm = h.astype(w.dtype)
            b = biases[i:i + 1, :out_widths[i]]     # (1, D_{i+1}_pad)
            h = jnp.dot(h_mm, w, preferred_element_type=jnp.float32) + b
            if i < num_layers - 1:
                h = jnp.tanh(h)

        out_ref[...] = h.astype(out_ref.dtype)      # lane-dense store

    return kernel


def estimator_forward(s, params, *, tile_batch=512, weight_dtype=jnp.float32):
    """JAX wrapper: flatten, fold BN into Linear1, pad, tile batch, run kernel.

    Args:
      s: (batch, *state_shape) float32 state tensor.
      params: dict with bn_{gamma,beta,mean,var} and w1,b1,...,wN,bN
              (weights stored as (in_features, out_features)).
      tile_batch: max rows per grid step (rounded to a multiple of 8).
      weight_dtype: jnp.float32 (default) or jnp.bfloat16 for v6e/v7x MXUs.
    Returns:
      (batch, action_num) float32 Q-values.
    """
    batch = s.shape[0]
    x = s.reshape(batch, -1).astype(jnp.float32)    # nn.Flatten() (row-major)
    d0 = x.shape[1]

    num_layers = sum(1 for k in params if k.startswith("w"))
    ws = [params[f"w{i}"] for i in range(1, num_layers + 1)]
    bs = [params[f"b{i}"].reshape(-1) for i in range(1, num_layers + 1)]
    action_num = ws[-1].shape[1]

    # --- Fold BatchNorm1d (inference semantics) into the first Linear. ---
    scale = (params["bn_gamma"] *
             jax.lax.rsqrt(params["bn_var"] + BN_EPS)).reshape(-1)      # (d0,)
    shift = params["bn_beta"].reshape(-1) - params["bn_mean"].reshape(-1) * scale
    ws = [ws[0] * scale[:, None]] + ws[1:]
    bs = [bs[0] + shift @ params["w1"]] + bs[1:]

    # --- Zero-pad every feature dim to a multiple of 128 (exact). ---
    in_dims = [d0] + [w.shape[1] for w in ws[:-1]]
    out_dims = [w.shape[1] for w in ws]
    in_pad = [_round_up(d, 128) for d in in_dims]
    out_pad = [_round_up(d, 128) for d in out_dims]

    ws_p = [
        jnp.pad(w, ((0, ip - w.shape[0]), (0, op - w.shape[1]))).astype(weight_dtype)
        for w, ip, op in zip(ws, in_pad, out_pad)
    ]
    wmax = max(out_pad)
    bias_slab = jnp.zeros((num_layers, wmax), jnp.float32)
    for i, b in enumerate(bs):
        bias_slab = bias_slab.at[i, :b.shape[0]].set(b)

    # --- Pad batch to a multiple of the tile and tile it over the grid. ---
    tb = min(_round_up(tile_batch, 8), _round_up(batch, 8))
    b_pad = _round_up(batch, tb)
    x_p = jnp.pad(x, ((0, b_pad - batch), (0, in_pad[0] - d0)))

    grid = (b_pad // tb,)
    kernel = _make_mlp_kernel(num_layers, out_pad)

    in_specs = [pl.BlockSpec((tb, in_pad[0]), lambda i: (i, 0))]
    for w in ws_p:
        # Constant index_map: weights DMA'd once, VMEM-resident across tiles.
        in_specs.append(pl.BlockSpec(w.shape, lambda i: (0, 0)))
    in_specs.append(pl.BlockSpec(bias_slab.shape, lambda i: (0, 0)))

    out_p = pl.pallas_call(
        kernel,
        out_shape=jax.ShapeDtypeStruct((b_pad, out_pad[-1]), jnp.float32),
        grid=grid,
        in_specs=in_specs,
        out_specs=pl.BlockSpec((tb, out_pad[-1]), lambda i: (i, 0)),
        compiler_params=pltpu.CompilerParams(
            dimension_semantics=("parallel",)),
    )(x_p, *ws_p, bias_slab)

    return out_p[:batch, :action_num]


def init_params(key, state_shape, mlp_layers, action_num):
    """Deterministic synthetic parameter init (not a checkpoint load)."""
    d0 = 1
    for d in state_shape:
        d0 *= int(d)
    dims = [d0] + list(mlp_layers) + [action_num]

    keys = jax.random.split(key, 2 * (len(dims) - 1))
    params = {
        # Freshly-initialized BatchNorm1d running stats / affine params.
        "bn_gamma": jnp.ones((1, d0), jnp.float32),
        "bn_beta": jnp.zeros((1, d0), jnp.float32),
        "bn_mean": jnp.zeros((1, d0), jnp.float32),
        "bn_var": jnp.ones((1, d0), jnp.float32),
    }
    for i in range(len(dims) - 1):
        fan_in, fan_out = dims[i], dims[i + 1]
        bound = 1.0 / (fan_in ** 0.5)   # matches torch.nn.Linear default range
        params[f"w{i + 1}"] = jax.random.uniform(
            keys[2 * i], (fan_in, fan_out), jnp.float32, -bound, bound)
        params[f"b{i + 1}"] = jax.random.uniform(
            keys[2 * i + 1], (1, fan_out), jnp.float32, -bound, bound)
    return params


def reference_forward(s, params):
    """Pure-JAX reference (explicit, un-folded BatchNorm) for checking."""
    x = s.reshape(s.shape[0], -1)
    h = (x - params["bn_mean"]) * jax.lax.rsqrt(params["bn_var"] + BN_EPS) \
        * params["bn_gamma"] + params["bn_beta"]
    num_layers = sum(1 for k in params if k.startswith("w"))
    for i in range(1, num_layers + 1):
        h = jnp.dot(h, params[f"w{i}"],
                    precision=jax.lax.Precision.HIGHEST) + params[f"b{i}"]
        if i < num_layers:
            h = jnp.tanh(h)
    return h


if __name__ == "__main__":
    # Small config consistent with the module:
    #   state_shape=[4, 16] -> flattened D0 = 64, mlp_layers=[32, 32],
    #   action_num=2, batch=2.
    state_shape = [4, 16]
    mlp_layers = [32, 32]
    action_num = 2
    batch = 2

    key = jax.random.PRNGKey(0)
    k_params, k_input = jax.random.split(key)

    params = init_params(k_params, state_shape, mlp_layers, action_num)
    s = jax.random.normal(k_input, (batch, *state_shape), jnp.float32)

    q = jax.block_until_ready(estimator_forward(s, params))
    q_ref = reference_forward(s, params)

    assert q.shape == (batch, action_num)
    assert jnp.allclose(q, q_ref, atol=1e-4, rtol=1e-4), (q, q_ref)

    print("KERNEL_OK")
</pallas_src>

<mosaic_0001>
module attributes {stable_mosaic.version = 11 : i64} {
  func.func @kernel(%arg0: i32, %arg1: memref<8x128xf32, #tpu.memory_space<vmem>>, %arg2: memref<128x128xf32, #tpu.memory_space<vmem>>, %arg3: memref<128x128xf32, #tpu.memory_space<vmem>>, %arg4: memref<128x128xf32, #tpu.memory_space<vmem>>, %arg5: memref<3x128xf32, #tpu.memory_space<vmem>>, %arg6: memref<8x128xf32, #tpu.memory_space<vmem>>) attributes {dimension_semantics = [#tpu.dimension_semantics<parallel>], iteration_bounds = array<i64: 1>, scalar_prefetch = 0 : i64, scratch_operands = 0 : i64, tpu.core_type = #tpu.core_type<tc>, window_params = [{transform_indices = @transform_0, window_bounds = array<i64: 8, 128>}, {pipeline_mode = #tpu.pipeline_mode<synchronous>, transform_indices = @transform_1, window_bounds = array<i64: 128, 128>}, {pipeline_mode = #tpu.pipeline_mode<synchronous>, transform_indices = @transform_2, window_bounds = array<i64: 128, 128>}, {pipeline_mode = #tpu.pipeline_mode<synchronous>, transform_indices = @transform_3, window_bounds = array<i64: 128, 128>}, {pipeline_mode = #tpu.pipeline_mode<synchronous>, transform_indices = @transform_4, window_bounds = array<i64: 3, 128>}, {transform_indices = @transform_5, window_bounds = array<i64: 8, 128>}]} {
    %c0 = arith.constant 0 : index
    %c0_0 = arith.constant 0 : index
    %0 = vector.load %arg1[%c0, %c0_0] : memref<8x128xf32, #tpu.memory_space<vmem>>, vector<8x128xf32>
    %c0_1 = arith.constant 0 : index
    %c0_2 = arith.constant 0 : index
    %1 = vector.load %arg5[%c0_1, %c0_2] : memref<3x128xf32, #tpu.memory_space<vmem>>, vector<3x128xf32>
    %c0_3 = arith.constant 0 : index
    %c0_4 = arith.constant 0 : index
    %2 = vector.load %arg2[%c0_3, %c0_4] : memref<128x128xf32, #tpu.memory_space<vmem>>, vector<128x128xf32>
    %3 = vector.extract_strided_slice %1 {offsets = [0, 0], sizes = [1, 128], strides = [1, 1]} : vector<3x128xf32> to vector<1x128xf32>
    %cst = arith.constant dense<0.000000e+00> : vector<8x128xf32>
    %4 = tpu.matmul %0, %2, %cst {dimension_numbers = #tpu.dot_dimension_numbers<[1], [0], [0], [1], [0, 0, 1, 1], [], []>} : vector<8x128xf32>, vector<128x128xf32>, vector<8x128xf32> -> vector<8x128xf32>
    %5 = vector.broadcast %3 : vector<1x128xf32> to vector<8x128xf32>
    %6 = arith.addf %4, %5 : vector<8x128xf32>
    %7 = math.tanh %6 : vector<8x128xf32>
    %c0_5 = arith.constant 0 : index
    %c0_6 = arith.constant 0 : index
    %8 = vector.load %arg3[%c0_5, %c0_6] : memref<128x128xf32, #tpu.memory_space<vmem>>, vector<128x128xf32>
    %9 = vector.extract_strided_slice %1 {offsets = [1, 0], sizes = [1, 128], strides = [1, 1]} : vector<3x128xf32> to vector<1x128xf32>
    %cst_7 = arith.constant dense<0.000000e+00> : vector<8x128xf32>
    %10 = tpu.matmul %7, %8, %cst_7 {dimension_numbers = #tpu.dot_dimension_numbers<[1], [0], [0], [1], [0, 0, 1, 1], [], []>} : vector<8x128xf32>, vector<128x128xf32>, vector<8x128xf32> -> vector<8x128xf32>
    %11 = vector.broadcast %9 : vector<1x128xf32> to vector<8x128xf32>
    %12 = arith.addf %10, %11 : vector<8x128xf32>
    %13 = math.tanh %12 : vector<8x128xf32>
    %c0_8 = arith.constant 0 : index
    %c0_9 = arith.constant 0 : index
    %14 = vector.load %arg4[%c0_8, %c0_9] : memref<128x128xf32, #tpu.memory_space<vmem>>, vector<128x128xf32>
    %15 = vector.extract_strided_slice %1 {offsets = [2, 0], sizes = [1, 128], strides = [1, 1]} : vector<3x128xf32> to vector<1x128xf32>
    %cst_10 = arith.constant dense<0.000000e+00> : vector<8x128xf32>
    %16 = tpu.matmul %13, %14, %cst_10 {dimension_numbers = #tpu.dot_dimension_numbers<[1], [0], [0], [1], [0, 0, 1, 1], [], []>} : vector<8x128xf32>, vector<128x128xf32>, vector<8x128xf32> -> vector<8x128xf32>
    %17 = vector.broadcast %15 : vector<1x128xf32> to vector<8x128xf32>
    %18 = arith.addf %16, %17 : vector<8x128xf32>
    %c0_11 = arith.constant 0 : index
    %c0_12 = arith.constant 0 : index
    %19 = vector.load %arg6[%c0_11, %c0_12] : memref<8x128xf32, #tpu.memory_space<vmem>>, vector<8x128xf32>
    tpu.vector_store %arg6[%c0_11, %c0_12], %18 {strides = array<i32>} : memref<8x128xf32, #tpu.memory_space<vmem>>, vector<8x128xf32>,
    return
  }
  func.func @transform_0(%arg0: i32) -> (i32, i32) {
    %c0_i32 = arith.constant 0 : i32
    %c0_i32_0 = arith.constant 0 : i32
    return %arg0, %c0_i32 : i32, i32
  }
  func.func @transform_1(%arg0: i32) -> (i32, i32) {
    %c0_i32 = arith.constant 0 : i32
    %c0_i32_0 = arith.constant 0 : i32
    %c0_i32_1 = arith.constant 0 : i32
    return %c0_i32, %c0_i32_0 : i32, i32
  }
  func.func @transform_2(%arg0: i32) -> (i32, i32) {
    %c0_i32 = arith.constant 0 : i32
    %c0_i32_0 = arith.constant 0 : i32
    %c0_i32_1 = arith.constant 0 : i32
    return %c0_i32, %c0_i32_0 : i32, i32
  }
  func.func @transform_3(%arg0: i32) -> (i32, i32) {
    %c0_i32 = arith.constant 0 : i32
    %c0_i32_0 = arith.constant 0 : i32
    %c0_i32_1 = arith.constant 0 : i32
    return %c0_i32, %c0_i32_0 : i32, i32
  }
  func.func @transform_4(%arg0: i32) -> (i32, i32) {
    %c0_i32 = arith.constant 0 : i32
    %c0_i32_0 = arith.constant 0 : i32
    %c0_i32_1 = arith.constant 0 : i32
    return %c0_i32, %c0_i32_0 : i32, i32
  }
  func.func @transform_5(%arg0: i32) -> (i32, i32) {
    %c0_i32 = arith.constant 0 : i32
    %c0_i32_0 = arith.constant 0 : i32
    return %arg0, %c0_i32 : i32, i32
  }
}

</mosaic_0001>

<bundles_post_ra>
// kernel: tpu_custom_call.1
= control target key start
LH: loop header
LB: loop body
LE: loop exit
PB: predicated region body
PF: predicated region fallthrough
CT: control target
= control target key end

     0   :  { %10 = vsyncpa [#allocation3], 0  ;;  %s763_s0 = inlined_call_operand.hbm [shape: f32[8,128], index: 0, kind: input, shape index: {}]   ;;  %s764_s1 = inlined_call_operand.hbm [shape: f32[128,128], index: 1, kind: input, shape index: {}]   ;;  %s765_s2 = inlined_call_operand.hbm [shape: f32[128,128], index: 2, kind: input, shape index: {}]   ;;  %s766_s3 = inlined_call_operand.hbm [shape: f32[128,128], index: 3, kind: input, shape index: {}]   ;;  %s767_s4 = inlined_call_operand.vmem [shape: f32[3,128], index: 4, kind: input, shape index: {}]   ;;  %s768_s5 = inlined_call_operand.hbm [shape: f32[8,128], index: 5, kind: output, shape index: {}]  }
   0x1   :  { %11 = vsyncpa [#allocation6], 0 }
   0x2   :  { %12 = vsyncpa [#allocation9], 0 }
   0x3   :  { %13 = vsyncpa [#allocation4], 0  ;;  %s643_s18 = smov [#allocation5]  }
   0x4   :  { %s29_s19 = sshll.u32 %s643_s18, 4  ;;  %s30_s19 = int_to_ptr.vmem [resolvable:$true] %s29_s19 }
   0x5   :  { %s543_s20 = scalar_lea.vmem %s30_s19, 2048  ;;  %p548_p1 = scmp.lt.s32.totalorder %s30_s19, %s30_s19 }
   0x6   :  { %p544_p0 = scmp.ne.s32.totalorder %s30_s19, %s543_s20  ;;  %p549_p2 = scmp.lt.s32.totalorder %s543_s20, %s543_s20 }
   0x8   :  { %p550_p3 = por %p549_p2, %p548_p1 }
   0xa   :  { %p551_p4 = pnand %p550_p3, %p544_p0 }
   0xc   :  { %554 = shalt.err (!%p551_p4)
}
   0xd   :  { %s644_s21 = smov 128   ;;  %s645_s22 = smov 8  }
   0xe   :  { %35 = dma.hbm_to_vmem [thread:$0]  %s764_s1, 2048, %s30_s19, [#allocation6], %s644_s21, %s644_s21, %s645_s22  }
   0xf   :  { %s646_s25 = smov [#allocation2]   ;;  %s647_s27 = smov [#allocation7]  }
  0x10   :  { %s20_s26 = sshll.u32 %s646_s25, 4  ;;  %s41_s28 = sshll.u32 %s647_s27, 4  ;;  %s21_s26 = int_to_ptr.vmem [resolvable:$true] %s20_s26  ;;  %s42_s28 = int_to_ptr.vmem [resolvable:$true] %s41_s28 }
  0x11   :  { %s563_s29 = scalar_lea.vmem %s21_s26, 128  ;;  %p568_p6 = scmp.lt.s32.totalorder %s21_s26, %s21_s26 }
  0x12   :  { %p564_p5 = scmp.ne.s32.totalorder %s21_s26, %s563_s29  ;;  %p569_p7 = scmp.lt.s32.totalorder %s563_s29, %s563_s29 }
  0x14   :  { %p570_p8 = por %p569_p7, %p568_p6 }
  0x16   :  { %p571_p9 = pnand %p570_p8, %p564_p5 }
  0x18   :  { %574 = shalt.err (!%p571_p9)
}
  0x19   :  { %23 = dma.hbm_to_vmem [thread:$0]  %s763_s0, 128, %s21_s26, [#allocation3]  }
  0x1a   :  { %s583_s7 = scalar_lea.vmem %s42_s28, 2048  ;;  %p588_p11 = scmp.lt.s32.totalorder %s42_s28, %s42_s28 }
  0x1b   :  { %p584_p10 = scmp.ne.s32.totalorder %s42_s28, %s583_s7  ;;  %p589_p12 = scmp.lt.s32.totalorder %s583_s7, %s583_s7 }
  0x1d   :  { %p590_p13 = por %p589_p12, %p588_p11 }
  0x1f   :  { %p591_p0 = pnand %p590_p13, %p584_p10 }
  0x21   :  { %594 = shalt.err (!%p591_p0)
}
  0x22   :  { %47 = dma.hbm_to_vmem [thread:$0]  %s765_s2, 2048, %s42_s28, [#allocation6], %s644_s21, %s644_s21, %s645_s22  }
  0x23   :  { %s648_s9 = smov [#allocation8]  }
  0x24   :  { %s53_s10 = sshll.u32 %s648_s9, 4  ;;  %s54_s10 = int_to_ptr.vmem [resolvable:$true] %s53_s10 }
  0x25   :  { %s603_s11 = scalar_lea.vmem %s54_s10, 2048  ;;  %p608_p2 = scmp.lt.s32.totalorder %s54_s10, %s54_s10 }
  0x26   :  { %p604_p1 = scmp.ne.s32.totalorder %s54_s10, %s603_s11  ;;  %p609_p3 = scmp.lt.s32.totalorder %s603_s11, %s603_s11 }
  0x28   :  { %p610_p4 = por %p609_p3, %p608_p2 }
  0x2a   :  { %p611_p5 = pnand %p610_p4, %p604_p1 }
  0x2c   :  { %614 = shalt.err (!%p611_p5)
}
  0x2d   :  { %59 = dma.hbm_to_vmem [thread:$0]  %s766_s3, 2048, %s54_s10, [#allocation9], %s644_s21, %s644_s21, %s645_s22  }
  0x2e   :  { %635 = dma.done.wait [#allocation3], 128  }
  0x2f   :  { %636 = vsyncadd [#allocation3], 4294967168 }
  0x30   :  { %637 = dma.done.wait [#allocation6], 4096  }
  0x31   :  { %638 = vsyncadd [#allocation6], 4294963200 }
  0x32   :  { %639 = dma.done.wait [#allocation9], 2048  }
  0x33   :  { %640 = vsyncadd [#allocation9], 4294965248  ;;  %v649_v0 = vmov 0.0   ;;  %vm650_vm0 = vmmov 0   ;;  %v91_v1 = vld [vmem:[#allocation5 + $0x78] sm:$0xff]  ;;  %v90_v2 = vld [vmem:[#allocation5 + $0x70] sm:$0xff]  ;;  %v92_v41 = vlaneseq }
  0x34   :  { %417 = vmatprep.subr.mxu0 %v649_v0  ;;  %449 = vmatprep.mubr.msk.f32.mxu0 %vm650_vm0, %v649_v0  ;;  %v89_v3 = vld [vmem:[#allocation5 + $0x68] sm:$0xff]  ;;  %v88_v4 = vld [vmem:[#allocation5 + $0x60] sm:$0xff]  ;;  %v182_v5 = vld [vmem:[#allocation7 + $0x78] sm:$0xff] }
  0x35   :  { %452 = vmatprep.subr.mxu1 %v649_v0  ;;  %484 = vmatprep.mubr.msk.f32.mxu1 %vm650_vm0, %v649_v0  ;;  %v87_v6 = vld [vmem:[#allocation5 + $0x58] sm:$0xff]  ;;  %v181_v7 = vld [vmem:[#allocation7 + $0x70] sm:$0xff]  ;;  %v180_v8 = vld [vmem:[#allocation7 + $0x68] sm:$0xff]  ;;  %v93_v42 = vshrl.u32 %v92_v41, 7 }
  0x36   :  { %418 = vmatpush3.msra.mxu0 %v91_v1  ;;  %453 = vmatpush3.msra.mxu1 %v182_v5  ;;  %v86_v9 = vld [vmem:[#allocation5 + $0x50] sm:$0xff]  ;;  %v179_v10 = vld [vmem:[#allocation7 + $0x60] sm:$0xff]  ;;  %v85_v11 = vld [vmem:[#allocation5 + $0x48] sm:$0xff] }
  0x37   :  { %419 = vmatprep.subr.mxu0 %v649_v0  ;;  %454 = vmatprep.subr.mxu1 %v649_v0  ;;  %v178_v12 = vld [vmem:[#allocation7 + $0x58] sm:$0xff]  ;;  %v84_v13 = vld [vmem:[#allocation5 + $0x40] sm:$0xff]  ;;  %v177_v14 = vld [vmem:[#allocation7 + $0x50] sm:$0xff]  ;;  %v94_v43 = vsub.s32 0, %v93_v42  ;;  %v185_v59 = vsub.s32 1, %v93_v42 }
  0x38   :  { %420 = vmatpush3.msra.mxu0 %v90_v2  ;;  %455 = vmatpush3.msra.mxu1 %v181_v7  ;;  %v83_v15 = vld [vmem:[#allocation5 + $0x38] sm:$0xff]  ;;  %v176_v16 = vld [vmem:[#allocation7 + $0x48] sm:$0xff]  ;;  %v82_v17 = vld [vmem:[#allocation5 + $0x30] sm:$0xff]  ;;  %v276_v2 = vsub.s32 2, %v93_v42 }
  0x39   :  { %421 = vmatprep.subr.mxu0 %v649_v0  ;;  %456 = vmatprep.subr.mxu1 %v649_v0  ;;  %v81_v18 = vld [vmem:[#allocation5 + $0x28] sm:$0xff]  ;;  %v80_v19 = vld [vmem:[#allocation5 + $0x20] sm:$0xff]  ;;  %v79_v20 = vld [vmem:[#allocation5 + $0x18] sm:$0xff] }
  0x3a   :  { %422 = vmatpush3.msra.mxu0 %v89_v3  ;;  %457 = vmatpush3.msra.mxu1 %v180_v8  ;;  %v78_v21 = vld [vmem:[#allocation5 + $0x10] sm:$0xff]  ;;  %v77_v22 = vld [vmem:[#allocation5 + $0x8] sm:$0xff]  ;;  %v76_v23 = vld [vmem:[#allocation5] sm:$0xff] }
  0x3b   :  { %423 = vmatprep.subr.mxu0 %v649_v0  ;;  %458 = vmatprep.subr.mxu1 %v649_v0  ;;  %v74_v24 = vld [vmem:[#allocation2] sm:$0xff]  ;;  %v175_v25 = vld [vmem:[#allocation7 + $0x40] sm:$0xff]  ;;  %v173_v27 = vld [vmem:[#allocation7 + $0x30] sm:$0xff] }
  0x3c   :  { %424 = vmatpush3.msra.mxu0 %v88_v4  ;;  %459 = vmatpush3.msra.mxu1 %v179_v10  ;;  %v174_v26 = vld [vmem:[#allocation7 + $0x38] sm:$0xff]  ;;  %v172_v28 = vld [vmem:[#allocation7 + $0x28] sm:$0xff]  ;;  %v171_v29 = vld [vmem:[#allocation7 + $0x20] sm:$0xff] }
  0x3d   :  { %425 = vmatprep.subr.mxu0 %v649_v0  ;;  %460 = vmatprep.subr.mxu1 %v649_v0  ;;  %v170_v30 = vld [vmem:[#allocation7 + $0x18] sm:$0xff]  ;;  %v169_v31 = vld [vmem:[#allocation7 + $0x10] sm:$0xff]  ;;  %v168_v32 = vld [vmem:[#allocation7 + $0x8] sm:$0xff] }
  0x3e   :  { %426 = vmatpush3.msra.mxu0 %v87_v6  ;;  %461 = vmatpush3.msra.mxu1 %v178_v12  ;;  %v167_v33 = vld [vmem:[#allocation7] sm:$0xff]  ;;  %v273_v34 = vld [vmem:[#allocation8 + $0x78] sm:$0xff]  ;;  %v272_v35 = vld [vmem:[#allocation8 + $0x70] sm:$0xff] }
  0x3f   :  { %427 = vmatprep.subr.mxu0 %v649_v0  ;;  %462 = vmatprep.subr.mxu1 %v649_v0  ;;  %v271_v36 = vld [vmem:[#allocation8 + $0x68] sm:$0xff]  ;;  %v270_v37 = vld [vmem:[#allocation8 + $0x60] sm:$0xff]  ;;  %v269_v38 = vld [vmem:[#allocation8 + $0x58] sm:$0xff] }
  0x40   :  { %428 = vmatpush3.msra.mxu0 %v86_v9  ;;  %463 = vmatpush3.msra.mxu1 %v177_v14  ;;  %v268_v39 = vld [vmem:[#allocation8 + $0x50] sm:$0xff]  ;;  %v267_v40 = vld [vmem:[#allocation8 + $0x48] sm:$0xff]  ;;  %v75_v44 = vld [vmem:[%s767_s4] sm:$0x7]  ;;  %s651_s4 = smov [#allocation10]  }
  0x41   :  { %429 = vmatprep.subr.mxu0 %v649_v0  ;;  %464 = vmatprep.subr.mxu1 %v649_v0  ;;  %v95_v45 = vrot.slane %v75_v44, %v94_v43  ;;  %v266_v50 = vld [vmem:[#allocation8 + $0x40] sm:$0xff]  ;;  %v265_v51 = vld [vmem:[#allocation8 + $0x38] sm:$0xff]  ;;  %v264_v52 = vld [vmem:[#allocation8 + $0x30] sm:$0xff]  ;;  %v186_v60 = vrot.slane %v75_v44, %v185_v59  ;;  %v277_v3 = vrot.slane %v75_v44, %v276_v2  ;;  %s355_s13 = sshll.u32 %s651_s4, 4  ;;  %s356_s13 = int_to_ptr.vmem [resolvable:$true] %s355_s13 }
  0x42   :  { %430 = vmatpush3.msra.mxu0 %v85_v11  ;;  %465 = vmatpush3.msra.mxu1 %v176_v16  ;;  %v263_v53 = vld [vmem:[#allocation8 + $0x28] sm:$0xff]  ;;  %v262_v54 = vld [vmem:[#allocation8 + $0x20] sm:$0xff]  ;;  %v261_v55 = vld [vmem:[#allocation8 + $0x18] sm:$0xff]  ;;  %s615_s14 = scalar_lea.vmem %s356_s13, 128  ;;  %p620_p7 = scmp.lt.s32.totalorder %s356_s13, %s356_s13 }
  0x43   :  { %431 = vmatprep.subr.mxu0 %v649_v0  ;;  %466 = vmatprep.subr.mxu1 %v649_v0  ;;  %v260_v56 = vld [vmem:[#allocation8 + $0x10] sm:$0xff]  ;;  %v259_v57 = vld [vmem:[#allocation8 + $0x8] sm:$0xff]  ;;  %v258_v58 = vld [vmem:[#allocation8] sm:$0xff]  ;;  %p616_p6 = scmp.ne.s32.totalorder %s356_s13, %s615_s14  ;;  %p621_p8 = scmp.lt.s32.totalorder %s615_s14, %s615_s14 }
  0x44   :  { %432 = vmatpush3.msra.mxu0 %v84_v13  ;;  %467 = vmatpush3.msra.mxu1 %v175_v25 }
  0x45   :  { %433 = vmatprep.subr.mxu0 %v649_v0  ;;  %468 = vmatprep.subr.mxu1 %v649_v0  ;;  %p622_p9 = por %p621_p8, %p620_p7 }
  0x46   :  { %434 = vmatpush3.msra.mxu0 %v83_v15  ;;  %469 = vmatpush3.msra.mxu1 %v174_v26 }
  0x47   :  { %435 = vmatprep.subr.mxu0 %v649_v0  ;;  %470 = vmatprep.subr.mxu1 %v649_v0  ;;  %p623_p10 = pnand %p622_p9, %p616_p6 }
  0x48   :  { %436 = vmatpush3.msra.mxu0 %v82_v17  ;;  %471 = vmatpush3.msra.mxu1 %v173_v27 }
  0x49   :  { %437 = vmatprep.subr.mxu0 %v649_v0  ;;  %472 = vmatprep.subr.mxu1 %v649_v0 }
  0x4a   :  { %438 = vmatpush3.msra.mxu0 %v81_v18  ;;  %473 = vmatpush3.msra.mxu1 %v172_v28 }
  0x4b   :  { %439 = vmatprep.subr.mxu0 %v649_v0  ;;  %474 = vmatprep.subr.mxu1 %v649_v0 }
  0x4c   :  { %440 = vmatpush3.msra.mxu0 %v80_v19  ;;  %475 = vmatpush3.msra.mxu1 %v171_v29 }
  0x4d   :  { %441 = vmatprep.subr.mxu0 %v649_v0  ;;  %476 = vmatprep.subr.mxu1 %v649_v0 }
  0x4e   :  { %442 = vmatpush3.msra.mxu0 %v79_v20  ;;  %477 = vmatpush3.msra.mxu1 %v170_v30 }
  0x4f   :  { %443 = vmatprep.subr.mxu0 %v649_v0  ;;  %478 = vmatprep.subr.mxu1 %v649_v0 }
  0x50   :  { %444 = vmatpush3.msra.mxu0 %v78_v21  ;;  %479 = vmatpush3.msra.mxu1 %v169_v31 }
  0x51   :  { %445 = vmatprep.subr.mxu0 %v649_v0  ;;  %480 = vmatprep.subr.mxu1 %v649_v0 }
  0x52   :  { %446 = vmatpush3.msra.mxu0 %v77_v22  ;;  %481 = vmatpush3.msra.mxu1 %v168_v32 }
  0x53   :  { %447 = vmatprep.subr.mxu0 %v649_v0  ;;  %482 = vmatprep.subr.mxu1 %v649_v0 }
  0x54   :  { %448 = vmatpush3.msra.mxu0 %v76_v23  ;;  %483 = vmatpush3.msra.mxu1 %v167_v33 }
  0x55   :  { %450 = vmatmul.mubr.f32.vlgmr.msra.gmra.mxu0 %v74_v24  ;;  %487 = vmatprep.subr.mxu0 %v649_v0 }
  0x56   :  { %519 = vmatprep.mubr.msk.f32.mxu0 %vm650_vm0, %v649_v0  ;;  %488 = vmatpush3.msra.mxu0 %v273_v34 }
  0x57   :  { %489 = vmatprep.subr.mxu0 %v649_v0 }
  0x58   :  { %490 = vmatpush3.msra.mxu0 %v272_v35 }
  0x59   :  { %491 = vmatprep.subr.mxu0 %v649_v0 }
  0x5a   :  { %492 = vmatpush3.msra.mxu0 %v271_v36 }
  0x5b   :  { %493 = vmatprep.subr.mxu0 %v649_v0 }
  0x5c   :  { %494 = vmatpush3.msra.mxu0 %v270_v37 }
  0x5d   :  { %495 = vmatprep.subr.mxu0 %v649_v0 }
  0x5e   :  { %496 = vmatpush3.msra.mxu0 %v269_v38 }
  0x5f   :  { %497 = vmatprep.subr.mxu0 %v649_v0 }
  0x60   :  { %498 = vmatpush3.msra.mxu0 %v268_v39 }
  0x61   :  { %499 = vmatprep.subr.mxu0 %v649_v0 }
  0x62   :  { %500 = vmatpush3.msra.mxu0 %v267_v40 }
  0x63   :  { %501 = vmatprep.subr.mxu0 %v649_v0 }
  0x64   :  { %502 = vmatpush3.msra.mxu0 %v266_v50 }
  0x65   :  { %503 = vmatprep.subr.mxu0 %v649_v0 }
  0x66   :  { %504 = vmatpush3.msra.mxu0 %v265_v51 }
  0x67   :  { %505 = vmatprep.subr.mxu0 %v649_v0 }
  0x68   :  { %506 = vmatpush3.msra.mxu0 %v264_v52 }
  0x69   :  { %507 = vmatprep.subr.mxu0 %v649_v0 }
  0x6a   :  { %508 = vmatpush3.msra.mxu0 %v263_v53 }
  0x6b   :  { %509 = vmatprep.subr.mxu0 %v649_v0 }
  0x6c   :  { %510 = vmatpush3.msra.mxu0 %v262_v54 }
  0x6d   :  { %511 = vmatprep.subr.mxu0 %v649_v0 }
  0x6e   :  { %512 = vmatpush3.msra.mxu0 %v261_v55 }
  0x6f   :  { %513 = vmatprep.subr.mxu0 %v649_v0 }
  0x70   :  { %514 = vmatpush3.msra.mxu0 %v260_v56 }
  0x71   :  { %515 = vmatprep.subr.mxu0 %v649_v0 }
  0x72   :  { %516 = vmatpush3.msra.mxu0 %v259_v57 }
  0x73   :  { %517 = vmatprep.subr.mxu0 %v649_v0 }
  0x74   :  { %518 = vmatpush3.msra.mxu0 %v258_v58 }
 0x115   :  { %v162_v46 = vpop.f32.mrf.mxu0 }
 0x116   :  { %v163_v47 = vadd.f32 %v162_v46, %v95_v45 }
 0x117   :  { %v451_v48 = vpop.f32.mrf.mxu0 }
 0x118   :  { %531 = vtanh.f32 %v163_v47 }
 0x125   :  { %v532_v49 = vpop.eup %531 }
 0x126   :  { %485 = vmatmul.mubr.f32.vlgmr.msra.gmra.mxu1 %v532_v49 }
 0x1e6   :  { %v253_v61 = vpop.f32.mrf.mxu1 }
 0x1e7   :  { %v254_v62 = vadd.f32 %v253_v61, %v186_v60 }
 0x1e8   :  { %v486_v63 = vpop.f32.mrf.mxu1 }
 0x1e9   :  { %533 = vtanh.f32 %v254_v62 }
 0x1f6   :  { %v534_v1 = vpop.eup %533 }
 0x1f7   :  { %520 = vmatmul.mubr.f32.vlgmr.msra.gmra.mxu0 %v534_v1 }
 0x2b7   :  { %v344_v4 = vpop.f32.mrf.mxu0 }
 0x2b8   :  { %v345_v5 = vadd.f32 %v344_v4, %v277_v3 }
 0x2b9   :  { %v521_v6 = vpop.f32.mrf.mxu0 }
 0x2ba   :  { %348 = vst [vmem:[#allocation10] sm:$0xff] %v345_v5 }
 0x2bb   :  { %626 = shalt.err (!%p623_p10)
}
 0x2bc   :  { %358 = dma.vmem_to_hbm [thread:$0]  %s356_s13, 128, %s768_s5, [#allocation4]  }
 0x2bd   :  { %641 = dma.done.wait [#allocation4], 128  }
 0x2be   :  { %642 = vsyncadd [#allocation4], 4294967168 }
 0x2bf   :  { %362 = vsyncpa [#allocation3], 1 }
 0x2c0   :  { %363 = vsyncpa [#allocation6], 1 }
 0x2c1   :  { %364 = vsyncpa [#allocation9], 1 }
 0x2c2   :  { %365 = vsyncpa [#allocation4], 1 }

</bundles_post_ra>
